<compile_context>
chip_gen: v6e
topology: v6e:2x2x1
jax: 0.10.0
libtpu: 0.0.40
codegen_flags: <defaults>
</compile_context>

<pallas_src>
import jax
import jax.numpy as jnp
from jax.experimental import pallas as pl
from jax.experimental.pallas import tpu as pltpu

_SUBLANES = 8
_LANES = 128
_MAX_BLOCK_ROWS = 512  # grow per-step block toward (512, 128) once batched


def _round_up(n, m):
    return ((n + m - 1) // m) * m


def _qcbm_expec_kernel(x_ref, ua_ref, ub_ref, w_ref, o_ref):
    """tanh(x*w0 + ua*w1 + ub*w2 + bias): full-vreg VPU FMAs + EUP tanh."""
    br = x_ref.shape[0]
    # Static, sublane-aligned slices of the pre-replicated weight slab: each is a full
    # (br, lanes) view, so every multiply/add below is a full-vreg VALU op (no sublane
    # broadcasts, no strided/masked loads in the body).
    w0 = w_ref[0 * br:1 * br, :]
    w1 = w_ref[1 * br:2 * br, :]
    w2 = w_ref[2 * br:3 * br, :]
    bias = w_ref[3 * br:4 * br, :]
    z = x_ref[...] * w0 + ua_ref[...] * w1 + ub_ref[...] * w2 + bias
    o_ref[...] = jnp.tanh(z)  # EUP transcendental, unmasked lane-dense vst


def qcbm_expec(x_pad, ua, ub, w_slab, *, block_rows):
    """Batched Pallas hot path on lane-dense padded slabs.

    x_pad/ua/ub: [rows, lanes] f32 with rows % block_rows == 0.
    w_slab:      [4*block_rows, lanes] pre-replicated (w0, w1, w2, bias) slab.
    """
    rows, lanes = x_pad.shape
    assert rows % block_rows == 0
    assert w_slab.shape == (4 * block_rows, lanes)

    row_spec = pl.BlockSpec((block_rows, lanes), lambda i: (i, 0))
    w_spec = pl.BlockSpec((4 * block_rows, lanes), lambda i: (0, 0))  # resident weights

    return pl.pallas_call(
        _qcbm_expec_kernel,
        out_shape=jax.ShapeDtypeStruct((rows, lanes), jnp.float32),
        grid=(rows // block_rows,),
        in_specs=[row_spec, row_spec, row_spec, w_spec],
        out_specs=row_spec,
        compiler_params=pltpu.CompilerParams(
            dimension_semantics=("parallel",)),  # batch axis -> both v7x TCs
    )(x_pad, ua, ub, w_slab)


class QCBMPrior:
    """JAX/Pallas port of QCBMPrior (measurement_setting 's'/'d')."""

    def __init__(self, nqubits, nlayers, measurement_setting="s",
                 key=jax.random.PRNGKey(42)):
        self.nqubits = nqubits
        self.nlayers = nlayers
        self.measurement_setting = measurement_setting
        self.lanes = _round_up(nqubits, _LANES)

        k1, k2 = jax.random.split(key)
        # Same parameter shapes as the torch module.
        self.params = 0.1 * jax.random.normal(k1, (nlayers, nqubits, 4), dtype=jnp.float32)
        self.q_weights_final = 0.1 * jax.random.normal(k2, (nqubits, 3), dtype=jnp.float32)

        # Surrogate circuit parameters: per-qubit 3-vector weight + scalar bias, packed
        # lane-dense (zero past nqubits). Exploits the block-diagonal structure so the
        # kernel never touches the MXU.
        wq = jnp.sum(self.params[..., :3], axis=0) + self.q_weights_final   # [nq, 3]
        bias = jnp.sum(self.params[..., 3], axis=0)                         # [nq]
        wb = jnp.concatenate([wq.T, bias[None, :]], axis=0)                 # [4, nq]
        self.wb = jnp.pad(wb, ((0, 0), (0, self.lanes - nqubits)))          # [4, lanes]
        # Pre-replicated (free at init, weights are static) to 8 sublanes so the kernel
        # only ever does full-vreg, sublane-aligned loads.
        self.w_slab8 = self._replicate_weights(_SUBLANES)                   # [32, lanes]

    def _replicate_weights(self, block_rows):
        return jnp.reshape(
            jnp.broadcast_to(self.wb[:, None, :], (4, block_rows, self.lanes)),
            (4 * block_rows, self.lanes))

    def __call__(self, inputs, temperature=1.0, key=jax.random.PRNGKey(1)):
        # `temperature` is accepted but unused on the 's'/'d' paths (as in the reference).
        nq = self.nqubits
        if self.measurement_setting not in ("s", "d"):
            # TODO(synk): 'o'/'t' branches depend on attributes undefined in the
            # reference (q_weights_basis, self.linear) and are not ported.
            raise NotImplementedError(self.measurement_setting)

        x = jnp.reshape(inputs, (-1, nq)).astype(jnp.float32)   # [B, nq] (B=6 for 's')
        b = x.shape[0]

        block_rows = min(_MAX_BLOCK_ROWS, _round_up(max(b, 1), _SUBLANES))
        rows = _round_up(max(b, 1), block_rows)
        x_pad = jnp.pad(x, ((0, rows - b), (0, self.lanes - nq)))   # lane-dense slab

        # Per-row noise channels via jax.random (interpret- and TPU-safe, key-reproducible).
        ka, kb = jax.random.split(key)
        ua = jax.random.uniform(ka, (rows, self.lanes), dtype=jnp.float32)
        ub = jax.random.uniform(kb, (rows, self.lanes), dtype=jnp.float32)

        w_slab = self.w_slab8 if block_rows == _SUBLANES else self._replicate_weights(block_rows)

        expec_pad = qcbm_expec(x_pad, ua, ub, w_slab, block_rows=block_rows)
        expec = expec_pad[:b, :nq]                       # values in (-1, 1)
        if self.measurement_setting == "s":
            return jnp.reshape(expec, (1, b * nq))       # [1, 120] for nq=20
        return expec                                     # 'd': expectations per row


if __name__ == "__main__":
    nqubits = 20     # 6 * nqubits == 120 latent outputs
    nlayers = 3

    model = QCBMPrior(nqubits, nlayers, measurement_setting="s",
                      key=jax.random.PRNGKey(42))

    key = jax.random.PRNGKey(0)
    k_in, k_seed = jax.random.split(key)
    inputs = jax.random.normal(k_in, (1, 6 * nqubits), dtype=jnp.float32)

    out = model(inputs, temperature=1.0, key=k_seed)
    out = jax.block_until_ready(out)

    assert out.shape == (1, 120), out.shape
    assert bool(jnp.all(jnp.isfinite(out)))
    assert bool(jnp.all(jnp.abs(out) <= 1.0))  # Pauli-Z expectation range
    print("KERNEL_OK")
</pallas_src>

<mosaic_0001>
module attributes {stable_mosaic.version = 11 : i64} {
  func.func @_qcbm_expec_kernel(%arg0: i32, %arg1: memref<8x128xf32, #tpu.memory_space<vmem>>, %arg2: memref<8x128xf32, #tpu.memory_space<vmem>>, %arg3: memref<8x128xf32, #tpu.memory_space<vmem>>, %arg4: memref<32x128xf32, #tpu.memory_space<vmem>>, %arg5: memref<8x128xf32, #tpu.memory_space<vmem>>) attributes {dimension_semantics = [#tpu.dimension_semantics<parallel>], iteration_bounds = array<i64: 1>, scalar_prefetch = 0 : i64, scratch_operands = 0 : i64, tpu.core_type = #tpu.core_type<tc>, window_params = [{transform_indices = @transform_0, window_bounds = array<i64: 8, 128>}, {transform_indices = @transform_1, window_bounds = array<i64: 8, 128>}, {transform_indices = @transform_2, window_bounds = array<i64: 8, 128>}, {pipeline_mode = #tpu.pipeline_mode<synchronous>, transform_indices = @transform_3, window_bounds = array<i64: 32, 128>}, {transform_indices = @transform_4, window_bounds = array<i64: 8, 128>}]} {
    %c0 = arith.constant 0 : index
    %c0_0 = arith.constant 0 : index
    %0 = vector.load %arg4[%c0, %c0_0] : memref<32x128xf32, #tpu.memory_space<vmem>>, vector<8x128xf32>
    %c8 = arith.constant 8 : index
    %c0_1 = arith.constant 0 : index
    %1 = vector.load %arg4[%c8, %c0_1] : memref<32x128xf32, #tpu.memory_space<vmem>>, vector<8x128xf32>
    %c16 = arith.constant 16 : index
    %c0_2 = arith.constant 0 : index
    %2 = vector.load %arg4[%c16, %c0_2] : memref<32x128xf32, #tpu.memory_space<vmem>>, vector<8x128xf32>
    %c24 = arith.constant 24 : index
    %c0_3 = arith.constant 0 : index
    %3 = vector.load %arg4[%c24, %c0_3] : memref<32x128xf32, #tpu.memory_space<vmem>>, vector<8x128xf32>
    %c0_4 = arith.constant 0 : index
    %c0_5 = arith.constant 0 : index
    %4 = vector.load %arg1[%c0_4, %c0_5] : memref<8x128xf32, #tpu.memory_space<vmem>>, vector<8x128xf32>
    %5 = arith.mulf %4, %0 : vector<8x128xf32>
    %c0_6 = arith.constant 0 : index
    %c0_7 = arith.constant 0 : index
    %6 = vector.load %arg2[%c0_6, %c0_7] : memref<8x128xf32, #tpu.memory_space<vmem>>, vector<8x128xf32>
    %7 = arith.mulf %6, %1 : vector<8x128xf32>
    %8 = arith.addf %5, %7 : vector<8x128xf32>
    %c0_8 = arith.constant 0 : index
    %c0_9 = arith.constant 0 : index
    %9 = vector.load %arg3[%c0_8, %c0_9] : memref<8x128xf32, #tpu.memory_space<vmem>>, vector<8x128xf32>
    %10 = arith.mulf %9, %2 : vector<8x128xf32>
    %11 = arith.addf %8, %10 : vector<8x128xf32>
    %12 = arith.addf %11, %3 : vector<8x128xf32>
    %13 = math.tanh %12 : vector<8x128xf32>
    %c0_10 = arith.constant 0 : index
    %c0_11 = arith.constant 0 : index
    %14 = vector.load %arg5[%c0_10, %c0_11] : memref<8x128xf32, #tpu.memory_space<vmem>>, vector<8x128xf32>
    tpu.vector_store %arg5[%c0_10, %c0_11], %13 {strides = array<i32>} : memref<8x128xf32, #tpu.memory_space<vmem>>, vector<8x128xf32>,
    return
  }
  func.func @transform_0(%arg0: i32) -> (i32, i32) {
    %c0_i32 = arith.constant 0 : i32
    %c0_i32_0 = arith.constant 0 : i32
    return %arg0, %c0_i32 : i32, i32
  }
  func.func @transform_1(%arg0: i32) -> (i32, i32) {
    %c0_i32 = arith.constant 0 : i32
    %c0_i32_0 = arith.constant 0 : i32
    return %arg0, %c0_i32 : i32, i32
  }
  func.func @transform_2(%arg0: i32) -> (i32, i32) {
    %c0_i32 = arith.constant 0 : i32
    %c0_i32_0 = arith.constant 0 : i32
    return %arg0, %c0_i32 : i32, i32
  }
  func.func @transform_3(%arg0: i32) -> (i32, i32) {
    %c0_i32 = arith.constant 0 : i32
    %c0_i32_0 = arith.constant 0 : i32
    %c0_i32_1 = arith.constant 0 : i32
    return %c0_i32, %c0_i32_0 : i32, i32
  }
  func.func @transform_4(%arg0: i32) -> (i32, i32) {
    %c0_i32 = arith.constant 0 : i32
    %c0_i32_0 = arith.constant 0 : i32
    return %arg0, %c0_i32 : i32, i32
  }
}

</mosaic_0001>

<bundles_post_ra>
// kernel: tpu_custom_call.1
= control target key start
LH: loop header
LB: loop body
LE: loop exit
PB: predicated region body
PF: predicated region fallthrough
CT: control target
= control target key end

     0   :  { %9 = vsyncpa [#allocation3], 0  ;;  %s263_s0 = inlined_call_operand.hbm [shape: f32[8,128], index: 0, kind: input, shape index: {}]   ;;  %s264_s1 = inlined_call_operand.hbm [shape: f32[8,128], index: 1, kind: input, shape index: {}]   ;;  %s265_s2 = inlined_call_operand.hbm [shape: f32[8,128], index: 2, kind: input, shape index: {}]   ;;  %s266_s3 = inlined_call_operand.hbm [shape: f32[32,128], index: 3, kind: input, shape index: {}]   ;;  %s267_s4 = inlined_call_operand.hbm [shape: f32[8,128], index: 4, kind: output, shape index: {}]  }
   0x1   :  { %10 = vsyncpa [#allocation6], 0 }
   0x2   :  { %11 = vsyncpa [#allocation9], 0 }
   0x3   :  { %12 = vsyncpa [#allocation4], 0  ;;  %s216_s15 = smov [#allocation5]   ;;  %s217_s17 = smov [#allocation2]  }
   0x4   :  { %s29_s16 = sshll.u32 %s216_s15, 4  ;;  %s19_s18 = sshll.u32 %s217_s17, 4  ;;  %s30_s16 = int_to_ptr.vmem [resolvable:$true] %s29_s16  ;;  %s20_s18 = int_to_ptr.vmem [resolvable:$true] %s19_s18 }
   0x5   :  { %s116_s19 = scalar_lea.vmem %s30_s16, 128  ;;  %p121_p1 = scmp.lt.s32.totalorder %s30_s16, %s30_s16 }
   0x6   :  { %p117_p0 = scmp.ne.s32.totalorder %s30_s16, %s116_s19  ;;  %p122_p2 = scmp.lt.s32.totalorder %s116_s19, %s116_s19 }
   0x8   :  { %p123_p3 = por %p122_p2, %p121_p1 }
   0xa   :  { %p124_p4 = pnand %p123_p3, %p117_p0 }
   0xc   :  { %127 = shalt.err (!%p124_p4)
}
   0xd   :  { %32 = dma.hbm_to_vmem [thread:$0]  %s264_s1, 128, %s30_s16, [#allocation6]  }
   0xe   :  { %s136_s22 = scalar_lea.vmem %s20_s18, 128  ;;  %p141_p6 = scmp.lt.s32.totalorder %s20_s18, %s20_s18 }
   0xf   :  { %p137_p5 = scmp.ne.s32.totalorder %s20_s18, %s136_s22  ;;  %p142_p7 = scmp.lt.s32.totalorder %s136_s22, %s136_s22 }
  0x11   :  { %p143_p8 = por %p142_p7, %p141_p6 }
  0x13   :  { %p144_p9 = pnand %p143_p8, %p137_p5 }
  0x15   :  { %147 = shalt.err (!%p144_p9)
}
  0x16   :  { %22 = dma.hbm_to_vmem [thread:$0]  %s263_s0, 128, %s20_s18, [#allocation3]  }
  0x17   :  { %s218_s25 = smov [#allocation7]   ;;  %s219_s27 = smov [#allocation8]  }
  0x18   :  { %s39_s26 = sshll.u32 %s218_s25, 4  ;;  %s48_s28 = sshll.u32 %s219_s27, 4  ;;  %s40_s26 = int_to_ptr.vmem [resolvable:$true] %s39_s26  ;;  %s49_s28 = int_to_ptr.vmem [resolvable:$true] %s48_s28 }
  0x19   :  { %s156_s29 = scalar_lea.vmem %s40_s26, 128  ;;  %p161_p11 = scmp.lt.s32.totalorder %s40_s26, %s40_s26 }
  0x1a   :  { %p157_p10 = scmp.ne.s32.totalorder %s40_s26, %s156_s29  ;;  %p162_p12 = scmp.lt.s32.totalorder %s156_s29, %s156_s29 }
  0x1c   :  { %p163_p13 = por %p162_p12, %p161_p11 }
  0x1e   :  { %p164_p0 = pnand %p163_p13, %p157_p10 }
  0x20   :  { %167 = shalt.err (!%p164_p0)
}
  0x21   :  { %42 = dma.hbm_to_vmem [thread:$0]  %s265_s2, 128, %s40_s26, [#allocation6]  }
  0x22   :  { %s176_s5 = scalar_lea.vmem %s49_s28, 512  ;;  %p181_p2 = scmp.lt.s32.totalorder %s49_s28, %s49_s28 }
  0x23   :  { %p177_p1 = scmp.ne.s32.totalorder %s49_s28, %s176_s5  ;;  %p182_p3 = scmp.lt.s32.totalorder %s176_s5, %s176_s5 }
  0x25   :  { %p183_p4 = por %p182_p3, %p181_p2 }
  0x27   :  { %p184_p5 = pnand %p183_p4, %p177_p1 }
  0x29   :  { %187 = shalt.err (!%p184_p5)
}
  0x2a   :  { %s220_s0 = smov 128   ;;  %s221_s6 = smov 8  }
  0x2b   :  { %54 = dma.hbm_to_vmem [thread:$0]  %s266_s3, 512, %s49_s28, [#allocation9], %s220_s0, %s220_s0, %s221_s6  }
  0x2c   :  { %208 = dma.done.wait [#allocation3], 128  }
  0x2d   :  { %209 = vsyncadd [#allocation3], 4294967168 }
  0x2e   :  { %210 = dma.done.wait [#allocation6], 256  }
  0x2f   :  { %211 = vsyncadd [#allocation6], 4294967040 }
  0x30   :  { %212 = dma.done.wait [#allocation9], 512  }
  0x31   :  { %213 = vsyncadd [#allocation9], 4294966784  ;;  %v67_v0 = vld [vmem:[#allocation8] sm:$0xff]  ;;  %v68_v1 = vld [vmem:[#allocation8 + $0x8] sm:$0xff]  ;;  %s222_s2 = smov [#allocation10]  }
  0x32   :  { %v69_v2 = vld [vmem:[#allocation8 + $0x10] sm:$0xff]  ;;  %v71_v3 = vld [vmem:[#allocation2] sm:$0xff]  ;;  %v76_v7 = vld [vmem:[#allocation7] sm:$0xff]  ;;  %s88_s3 = sshll.u32 %s222_s2, 4  ;;  %s89_s3 = int_to_ptr.vmem [resolvable:$true] %s88_s3 }
  0x33   :  { %v73_v4 = vld [vmem:[#allocation5] sm:$0xff]  ;;  %v72_v5 = vmul.f32 %v71_v3, %v67_v0  ;;  %v77_v8 = vmul.f32 %v76_v7, %v69_v2  ;;  %v70_v10 = vld [vmem:[#allocation8 + $0x18] sm:$0xff]  ;;  %s188_s9 = scalar_lea.vmem %s89_s3, 128  ;;  %p193_p7 = scmp.lt.s32.totalorder %s89_s3, %s89_s3 }
  0x34   :  { %v74_v6 = vmul.f32 %v73_v4, %v68_v1  ;;  %p189_p6 = scmp.ne.s32.totalorder %s89_s3, %s188_s9  ;;  %p194_p8 = scmp.lt.s32.totalorder %s188_s9, %s188_s9 }
  0x36   :  { %v75_v9 = vadd.f32 %v74_v6, %v72_v5  ;;  %p195_p9 = por %p194_p8, %p193_p7 }
  0x38   :  { %v78_v11 = vadd.f32 %v77_v8, %v75_v9  ;;  %p196_p10 = pnand %p195_p9, %p189_p6 }
  0x3a   :  { %v79_v12 = vadd.f32 %v78_v11, %v70_v10 }
  0x3c   :  { %106 = vtanh.f32 %v79_v12 }
  0x49   :  { %v107_v13 = vpop.eup %106 }
  0x4a   :  { %81 = vst [vmem:[#allocation10] sm:$0xff] %v107_v13 }
  0x4b   :  { %199 = shalt.err (!%p196_p10)
}
  0x4c   :  { %91 = dma.vmem_to_hbm [thread:$0]  %s89_s3, 128, %s267_s4, [#allocation4]  }
  0x4d   :  { %214 = dma.done.wait [#allocation4], 128  }
  0x4e   :  { %215 = vsyncadd [#allocation4], 4294967168 }
  0x4f   :  { %95 = vsyncpa [#allocation3], 1 }
  0x50   :  { %96 = vsyncpa [#allocation6], 1 }
  0x51   :  { %97 = vsyncpa [#allocation9], 1 }
  0x52   :  { %98 = vsyncpa [#allocation4], 1 }

</bundles_post_ra>
